<compile_context>
chip_gen: v5e
topology: v5e:2x2
jax: 0.10.0
libtpu: 0.0.40
codegen_flags: <defaults>
</compile_context>

<pallas_src>
import math

import jax
import jax.numpy as jnp
from jax.experimental import pallas as pl
from jax.experimental.pallas import tpu as pltpu


def _round_up(x, m):
    return (x + m - 1) // m * m


def _fused_refine_kernel(seg_ref, qp_ref, w_ref, c_ref, lw_ref, lb_ref, o_ref):
    """Grid = (row tiles,), all marked "parallel".

    All weights / constants are constant-resident VMEM blocks (same block
    index every grid step -> fetched once).  The layer loop is unrolled inside
    the body, and o_ref itself is the resident accumulator.

    Constant bank c_ref rows:
      0: ref_point_head b1   1: ref_point_head b2
      2: query_scale  b1     3: query_scale  b2
      4: 2*pi / dim_t        5: sin/cos phase ({0, pi/2})
    Weight bank w_ref slabs: 0: wr1  1: wr2  2: wq1  3: wq2 (bf16).
    """
    mm_dtype = w_ref.dtype            # matmul operand dtype (bf16 by default)
    num_layers = lw_ref.shape[0]

    # --- layer-invariant positional path (computed once per row tile) -------
    # gen_sineembed_for_position with the even/odd sin/cos parity folded into
    # a per-lane phase:  result = sin(sigmoid(qp) * 2*pi/dim_t + phase)
    ang = jax.nn.sigmoid(qp_ref[...]) * c_ref[4:5, :] + c_ref[5:6, :]
    sine = jnp.sin(ang)                                        # f32 [tm, C]

    # ref_point_head: MLP(d, d, d, 2) -> query_pos (layer-invariant)
    h = jnp.dot(sine.astype(mm_dtype), w_ref[0],
                preferred_element_type=jnp.float32) + c_ref[0:1, :]
    h = jnp.maximum(h, 0.0)
    qpos = jnp.dot(h.astype(mm_dtype), w_ref[1],
                   preferred_element_type=jnp.float32) + c_ref[1:2, :]

    # running `output` starts as segment_feat (f32 resident value)
    out = seg_ref[...]

    def decoder_layer(x, qse, layer):
        # TODO(synk): the injected `decoder_layer` is not defined by the
        # reference module; synthetic residual-FFN stand-in consuming
        # (output, query_pos, query_sine_embed).  memory / pos / roi_feat /
        # roi_pos / tgt / masks are unused.
        z = x + qpos + qse
        y = jnp.dot(z.astype(mm_dtype), lw_ref[layer],
                    preferred_element_type=jnp.float32) + lb_ref[layer:layer + 1, :]
        return x + jnp.maximum(y, 0.0)

    # layer 0: pos_transformation == 1  ->  query_sine_embed = sine
    out = decoder_layer(out, sine, 0)

    # layers 1..L-1: query_scale MLP on the running output scales the sine emb
    for layer in range(1, num_layers):
        g = jnp.dot(out.astype(mm_dtype), w_ref[2],
                    preferred_element_type=jnp.float32) + c_ref[2:3, :]
        g = jnp.maximum(g, 0.0)
        pt = jnp.dot(g.astype(mm_dtype), w_ref[3],
                     preferred_element_type=jnp.float32) + c_ref[3:4, :]
        out = decoder_layer(out, sine * pt, layer)

    o_ref[...] = out


def refine_decoder_forward(tgt, memory, segment_feat, roi_feat, pos, roi_pos,
                           query_pos, params, *, tm=1024,
                           compute_dtype=jnp.bfloat16):
    """JAX/Pallas port of RefineDecoder.forward (return_intermediate=False, norm=None)."""
    b, n, c = tgt.shape
    num_layers = params["layer_w"].shape[0]

    # -- glue: the permutes from the PyTorch forward (plain JAX reshapes) --
    output = jnp.transpose(segment_feat, (1, 0, 2)).reshape(n * b, c).astype(jnp.float32)
    qp = jnp.transpose(query_pos, (1, 0, 2)).reshape(n * b, 1).astype(jnp.float32)
    # (memory, pos, roi_feat, roi_pos, tgt only feed the injected decoder_layer
    #  -- see TODO(synk) inside the kernel.)

    N, C = n * b, c
    C_pad = _round_up(C, 128)            # lane-dense channel axis

    # row tile: as big as fits, but split into >= 2 tiles when there are
    # enough rows so both v7x TensorCores get work (rounded to 8 sublanes to
    # avoid large padded-row waste).
    tm_eff = min(tm, _round_up(N, 8))
    if _round_up(N, tm_eff) == tm_eff and N >= 512:
        tm_eff = _round_up((N + 1) // 2, 8)
    N_pad = _round_up(N, tm_eff)

    # zero-pad rows / lanes (exactly equivalent on the real lanes: padded
    # weight rows/cols, padded biases, padded inv_dim_t/phase are all zero,
    # so padded lanes stay exactly zero through every layer).
    seg_p = jnp.zeros((N_pad, C_pad), jnp.float32).at[:N, :C].set(output)
    qp_p = jnp.zeros((N_pad, 1), jnp.float32).at[:N, :].set(qp)

    # positional-embedding constants precomputed outside the kernel:
    #   inv_dim_t = 2*pi / 10000^(2*floor(k/2)/C),  phase in {0, pi/2}
    k = jnp.arange(C, dtype=jnp.float32)
    dim_t = 10000.0 ** (2.0 * jnp.floor(k / 2.0) / C)
    inv_dimt = (2.0 * math.pi) / dim_t
    phase = jnp.where(jnp.arange(C) % 2 == 0, 0.0, 0.5 * math.pi).astype(jnp.float32)

    # (8, C_pad) f32 constant bank: biases + inv_dim_t + phase.
    consts = jnp.zeros((8, C_pad), jnp.float32)
    consts = consts.at[0, :C].set(params["br1"].reshape(-1).astype(jnp.float32))
    consts = consts.at[1, :C].set(params["br2"].reshape(-1).astype(jnp.float32))
    consts = consts.at[2, :C].set(params["bq1"].reshape(-1).astype(jnp.float32))
    consts = consts.at[3, :C].set(params["bq2"].reshape(-1).astype(jnp.float32))
    consts = consts.at[4, :C].set(inv_dimt)
    consts = consts.at[5, :C].set(phase)

    # (4, C_pad, C_pad) bf16 weight bank: wr1, wr2, wq1, wq2.
    mlp_w = jnp.zeros((4, C_pad, C_pad), compute_dtype)
    for idx, name in enumerate(("wr1", "wr2", "wq1", "wq2")):
        mlp_w = mlp_w.at[idx, :C, :C].set(params[name].astype(compute_dtype))

    layer_w = jnp.zeros((num_layers, C_pad, C_pad), compute_dtype
                        ).at[:, :C, :C].set(params["layer_w"].astype(compute_dtype))
    layer_b = jnp.zeros((num_layers, C_pad), jnp.float32
                        ).at[:, :C].set(params["layer_b"].reshape(num_layers, c).astype(jnp.float32))

    row = lambda i: (i, 0)               # per-row-tile blocks
    in_specs = [
        pl.BlockSpec((tm_eff, C_pad), row),                          # segment_feat
        pl.BlockSpec((tm_eff, 1), row),                              # ref-point logits
        pl.BlockSpec((4, C_pad, C_pad), lambda i: (0, 0, 0)),        # MLP weight bank
        pl.BlockSpec((8, C_pad), lambda i: (0, 0)),                  # constant bank
        pl.BlockSpec((num_layers, C_pad, C_pad), lambda i: (0, 0, 0)),  # layer weights
        pl.BlockSpec((num_layers, C_pad), lambda i: (0, 0)),         # layer biases
    ]

    # advisory cost for XLA's scheduler: 3 matmuls per layer per row.
    weight_bytes = ((4 + num_layers) * C_pad * C_pad * 2
                    + (8 + num_layers) * C_pad * 4)
    cost = pl.CostEstimate(
        flops=2 * N_pad * C_pad * C_pad * 3 * num_layers,
        transcendentals=N_pad * (C_pad + 1),
        bytes_accessed=2 * N_pad * C_pad * 4 + N_pad * 4 + weight_bytes)

    # VMEM budget: double-buffered seg/out row tiles + qp + resident weights.
    vmem_est = (4 * tm_eff * C_pad * 4          # seg in + out blocks (x2 buffers)
                + 2 * tm_eff * 128 * 4          # qp block (lane-padded), x2 buffers
                + 2 * weight_bytes)             # constant-resident banks
    cp_kwargs = dict(dimension_semantics=("parallel",))
    if vmem_est > (16 << 20):                   # smallest scoped default (v5e)
        cp_kwargs["vmem_limit_bytes"] = min(int(vmem_est) + (4 << 20), 64 << 20)

    out_full = pl.pallas_call(
        _fused_refine_kernel,
        out_shape=jax.ShapeDtypeStruct((N_pad, C_pad), jnp.float32),
        grid_spec=pltpu.PrefetchScalarGridSpec(
            num_scalar_prefetch=0,
            grid=(N_pad // tm_eff,),
            in_specs=in_specs,
            out_specs=pl.BlockSpec((tm_eff, C_pad), row)),
        compiler_params=pltpu.CompilerParams(**cp_kwargs),
        cost_estimate=cost,
    )(seg_p, qp_p, mlp_w, consts, layer_w, layer_b)

    out = out_full[:N, :C]
    # output.unsqueeze(0): [1, num_queries, batch, c]
    return out.reshape(1, n, b, c)


if __name__ == "__main__":
    key = jax.random.PRNGKey(0)
    b, n, c, t, l = 2, 8, 32, 16, 4     # batch, num_queries, d_model, memory len, roi len
    num_layers = 3

    keys = jax.random.split(key, 20)
    f = lambda k, s: 0.1 * jax.random.normal(k, s, jnp.float32)

    # deterministic parameter init (shapes follow RefineDecoder.__init__)
    params = {
        "wr1": f(keys[0], (c, c)), "br1": f(keys[1], (1, c)),   # ref_point_head layer 0
        "wr2": f(keys[2], (c, c)), "br2": f(keys[3], (1, c)),   # ref_point_head layer 1
        "wq1": f(keys[4], (c, c)), "bq1": f(keys[5], (1, c)),   # query_scale layer 0
        "wq2": f(keys[6], (c, c)), "bq2": f(keys[7], (1, c)),   # query_scale layer 1
        "layer_w": f(keys[8], (num_layers, c, c)),              # synthetic decoder layers
        "layer_b": f(keys[9], (num_layers, 1, c)),
    }

    tgt          = f(keys[10], (b, n, c))
    memory       = f(keys[11], (b, t, c))
    segment_feat = f(keys[12], (b, n, c))
    roi_feat     = f(keys[13], (b, n, l, c))
    pos          = f(keys[14], (t, b, c))
    roi_pos      = f(keys[15], (b, n, l, c))
    query_pos    = f(keys[16], (b, n, 1))

    out = refine_decoder_forward(tgt, memory, segment_feat, roi_feat, pos,
                                 roi_pos, query_pos, params)
    jax.block_until_ready(out)
    assert out.shape == (1, n, b, c)
    assert bool(jnp.all(jnp.isfinite(out)))
    print("KERNEL_OK")
</pallas_src>

<mosaic_0001>
module attributes {stable_mosaic.version = 11 : i64} {
  func.func @_fused_refine_kernel(%arg0: i32, %arg1: memref<16x128xf32, #tpu.memory_space<vmem>>, %arg2: memref<16x1xf32, #tpu.memory_space<vmem>>, %arg3: memref<4x128x128xbf16, #tpu.memory_space<vmem>>, %arg4: memref<8x128xf32, #tpu.memory_space<vmem>>, %arg5: memref<3x128x128xbf16, #tpu.memory_space<vmem>>, %arg6: memref<3x128xf32, #tpu.memory_space<vmem>>, %arg7: memref<16x128xf32, #tpu.memory_space<vmem>>) attributes {dimension_semantics = [#tpu.dimension_semantics<parallel>], iteration_bounds = array<i64: 1>, scalar_prefetch = 0 : i64, scratch_operands = 0 : i64, tpu.core_type = #tpu.core_type<tc>, window_params = [{transform_indices = @transform_0, window_bounds = array<i64: 16, 128>}, {transform_indices = @transform_1, window_bounds = array<i64: 16, 1>}, {pipeline_mode = #tpu.pipeline_mode<synchronous>, transform_indices = @transform_2, window_bounds = array<i64: 4, 128, 128>}, {pipeline_mode = #tpu.pipeline_mode<synchronous>, transform_indices = @transform_3, window_bounds = array<i64: 8, 128>}, {pipeline_mode = #tpu.pipeline_mode<synchronous>, transform_indices = @transform_4, window_bounds = array<i64: 3, 128, 128>}, {pipeline_mode = #tpu.pipeline_mode<synchronous>, transform_indices = @transform_5, window_bounds = array<i64: 3, 128>}, {transform_indices = @transform_6, window_bounds = array<i64: 16, 128>}]} {
    %c0 = arith.constant 0 : index
    %c0_0 = arith.constant 0 : index
    %0 = vector.load %arg2[%c0, %c0_0] : memref<16x1xf32, #tpu.memory_space<vmem>>, vector<16x1xf32>
    %1 = arith.negf %0 : vector<16x1xf32>
    %2 = math.exp %1 : vector<16x1xf32>
    %cst = arith.constant 1.000000e+00 : f32
    %3 = vector.broadcast %cst : f32 to vector<16x1xf32>
    %4 = arith.addf %3, %2 : vector<16x1xf32>
    %5 = arith.divf %3, %4 : vector<16x1xf32>
    %c4 = arith.constant 4 : index
    %c0_1 = arith.constant 0 : index
    %6 = vector.load %arg4[%c4, %c0_1] : memref<8x128xf32, #tpu.memory_space<vmem>>, vector<1x128xf32>
    %7 = vector.broadcast %5 : vector<16x1xf32> to vector<16x128xf32>
    %8 = vector.broadcast %6 : vector<1x128xf32> to vector<16x128xf32>
    %9 = arith.mulf %7, %8 : vector<16x128xf32>
    %c5 = arith.constant 5 : index
    %c0_2 = arith.constant 0 : index
    %10 = vector.load %arg4[%c5, %c0_2] : memref<8x128xf32, #tpu.memory_space<vmem>>, vector<1x128xf32>
    %11 = vector.broadcast %10 : vector<1x128xf32> to vector<16x128xf32>
    %12 = arith.addf %9, %11 : vector<16x128xf32>
    %13 = math.sin %12 : vector<16x128xf32>
    %14 = arith.truncf %13 : vector<16x128xf32> to vector<16x128xbf16>
    %c0_3 = arith.constant 0 : index
    %c0_4 = arith.constant 0 : index
    %c0_5 = arith.constant 0 : index
    %15 = vector.load %arg3[%c0_3, %c0_4, %c0_5] : memref<4x128x128xbf16, #tpu.memory_space<vmem>>, vector<1x128x128xbf16>
    %16 = vector.shape_cast %15 : vector<1x128x128xbf16> to vector<128x128xbf16>
    %cst_6 = arith.constant dense<0.000000e+00> : vector<16x128xf32>
    %17 = tpu.matmul %14, %16, %cst_6 {dimension_numbers = #tpu.dot_dimension_numbers<[1], [0], [0], [1], [0, 0, 1, 1], [], []>} : vector<16x128xbf16>, vector<128x128xbf16>, vector<16x128xf32> -> vector<16x128xf32>
    %c0_7 = arith.constant 0 : index
    %c0_8 = arith.constant 0 : index
    %18 = vector.load %arg4[%c0_7, %c0_8] : memref<8x128xf32, #tpu.memory_space<vmem>>, vector<1x128xf32>
    %19 = vector.broadcast %18 : vector<1x128xf32> to vector<16x128xf32>
    %20 = arith.addf %17, %19 : vector<16x128xf32>
    %cst_9 = arith.constant 0.000000e+00 : f32
    %21 = vector.broadcast %cst_9 : f32 to vector<16x128xf32>
    %22 = arith.maximumf %20, %21 : vector<16x128xf32>
    %23 = arith.truncf %22 : vector<16x128xf32> to vector<16x128xbf16>
    %c1 = arith.constant 1 : index
    %c0_10 = arith.constant 0 : index
    %c0_11 = arith.constant 0 : index
    %24 = vector.load %arg3[%c1, %c0_10, %c0_11] : memref<4x128x128xbf16, #tpu.memory_space<vmem>>, vector<1x128x128xbf16>
    %25 = vector.shape_cast %24 : vector<1x128x128xbf16> to vector<128x128xbf16>
    %cst_12 = arith.constant dense<0.000000e+00> : vector<16x128xf32>
    %26 = tpu.matmul %23, %25, %cst_12 {dimension_numbers = #tpu.dot_dimension_numbers<[1], [0], [0], [1], [0, 0, 1, 1], [], []>} : vector<16x128xbf16>, vector<128x128xbf16>, vector<16x128xf32> -> vector<16x128xf32>
    %c1_13 = arith.constant 1 : index
    %c0_14 = arith.constant 0 : index
    %27 = vector.load %arg4[%c1_13, %c0_14] : memref<8x128xf32, #tpu.memory_space<vmem>>, vector<1x128xf32>
    %28 = vector.broadcast %27 : vector<1x128xf32> to vector<16x128xf32>
    %29 = arith.addf %26, %28 : vector<16x128xf32>
    %c0_15 = arith.constant 0 : index
    %c0_16 = arith.constant 0 : index
    %30 = vector.load %arg1[%c0_15, %c0_16] : memref<16x128xf32, #tpu.memory_space<vmem>>, vector<16x128xf32>
    %31 = arith.addf %30, %29 : vector<16x128xf32>
    %32 = arith.addf %31, %13 : vector<16x128xf32>
    %33 = arith.truncf %32 : vector<16x128xf32> to vector<16x128xbf16>
    %c0_17 = arith.constant 0 : index
    %c0_18 = arith.constant 0 : index
    %c0_19 = arith.constant 0 : index
    %34 = vector.load %arg5[%c0_17, %c0_18, %c0_19] : memref<3x128x128xbf16, #tpu.memory_space<vmem>>, vector<1x128x128xbf16>
    %35 = vector.shape_cast %34 : vector<1x128x128xbf16> to vector<128x128xbf16>
    %cst_20 = arith.constant dense<0.000000e+00> : vector<16x128xf32>
    %36 = tpu.matmul %33, %35, %cst_20 {dimension_numbers = #tpu.dot_dimension_numbers<[1], [0], [0], [1], [0, 0, 1, 1], [], []>} : vector<16x128xbf16>, vector<128x128xbf16>, vector<16x128xf32> -> vector<16x128xf32>
    %c0_21 = arith.constant 0 : index
    %c0_22 = arith.constant 0 : index
    %37 = vector.load %arg6[%c0_21, %c0_22] : memref<3x128xf32, #tpu.memory_space<vmem>>, vector<1x128xf32>
    %38 = vector.broadcast %37 : vector<1x128xf32> to vector<16x128xf32>
    %39 = arith.addf %36, %38 : vector<16x128xf32>
    %cst_23 = arith.constant 0.000000e+00 : f32
    %40 = vector.broadcast %cst_23 : f32 to vector<16x128xf32>
    %41 = arith.maximumf %39, %40 : vector<16x128xf32>
    %42 = arith.addf %30, %41 : vector<16x128xf32>
    %43 = arith.truncf %42 : vector<16x128xf32> to vector<16x128xbf16>
    %c2 = arith.constant 2 : index
    %c0_24 = arith.constant 0 : index
    %c0_25 = arith.constant 0 : index
    %44 = vector.load %arg3[%c2, %c0_24, %c0_25] : memref<4x128x128xbf16, #tpu.memory_space<vmem>>, vector<1x128x128xbf16>
    %45 = vector.shape_cast %44 : vector<1x128x128xbf16> to vector<128x128xbf16>
    %cst_26 = arith.constant dense<0.000000e+00> : vector<16x128xf32>
    %46 = tpu.matmul %43, %45, %cst_26 {dimension_numbers = #tpu.dot_dimension_numbers<[1], [0], [0], [1], [0, 0, 1, 1], [], []>} : vector<16x128xbf16>, vector<128x128xbf16>, vector<16x128xf32> -> vector<16x128xf32>
    %c2_27 = arith.constant 2 : index
    %c0_28 = arith.constant 0 : index
    %47 = vector.load %arg4[%c2_27, %c0_28] : memref<8x128xf32, #tpu.memory_space<vmem>>, vector<1x128xf32>
    %48 = vector.broadcast %47 : vector<1x128xf32> to vector<16x128xf32>
    %49 = arith.addf %46, %48 : vector<16x128xf32>
    %cst_29 = arith.constant 0.000000e+00 : f32
    %50 = vector.broadcast %cst_29 : f32 to vector<16x128xf32>
    %51 = arith.maximumf %49, %50 : vector<16x128xf32>
    %52 = arith.truncf %51 : vector<16x128xf32> to vector<16x128xbf16>
    %c3 = arith.constant 3 : index
    %c0_30 = arith.constant 0 : index
    %c0_31 = arith.constant 0 : index
    %53 = vector.load %arg3[%c3, %c0_30, %c0_31] : memref<4x128x128xbf16, #tpu.memory_space<vmem>>, vector<1x128x128xbf16>
    %54 = vector.shape_cast %53 : vector<1x128x128xbf16> to vector<128x128xbf16>
    %cst_32 = arith.constant dense<0.000000e+00> : vector<16x128xf32>
    %55 = tpu.matmul %52, %54, %cst_32 {dimension_numbers = #tpu.dot_dimension_numbers<[1], [0], [0], [1], [0, 0, 1, 1], [], []>} : vector<16x128xbf16>, vector<128x128xbf16>, vector<16x128xf32> -> vector<16x128xf32>
    %c3_33 = arith.constant 3 : index
    %c0_34 = arith.constant 0 : index
    %56 = vector.load %arg4[%c3_33, %c0_34] : memref<8x128xf32, #tpu.memory_space<vmem>>, vector<1x128xf32>
    %57 = vector.broadcast %56 : vector<1x128xf32> to vector<16x128xf32>
    %58 = arith.addf %55, %57 : vector<16x128xf32>
    %59 = arith.mulf %13, %58 : vector<16x128xf32>
    %60 = arith.addf %42, %29 : vector<16x128xf32>
    %61 = arith.addf %60, %59 : vector<16x128xf32>
    %62 = arith.truncf %61 : vector<16x128xf32> to vector<16x128xbf16>
    %c1_35 = arith.constant 1 : index
    %c0_36 = arith.constant 0 : index
    %c0_37 = arith.constant 0 : index
    %63 = vector.load %arg5[%c1_35, %c0_36, %c0_37] : memref<3x128x128xbf16, #tpu.memory_space<vmem>>, vector<1x128x128xbf16>
    %64 = vector.shape_cast %63 : vector<1x128x128xbf16> to vector<128x128xbf16>
    %cst_38 = arith.constant dense<0.000000e+00> : vector<16x128xf32>
    %65 = tpu.matmul %62, %64, %cst_38 {dimension_numbers = #tpu.dot_dimension_numbers<[1], [0], [0], [1], [0, 0, 1, 1], [], []>} : vector<16x128xbf16>, vector<128x128xbf16>, vector<16x128xf32> -> vector<16x128xf32>
    %c1_39 = arith.constant 1 : index
    %c0_40 = arith.constant 0 : index
    %66 = vector.load %arg6[%c1_39, %c0_40] : memref<3x128xf32, #tpu.memory_space<vmem>>, vector<1x128xf32>
    %67 = vector.broadcast %66 : vector<1x128xf32> to vector<16x128xf32>
    %68 = arith.addf %65, %67 : vector<16x128xf32>
    %cst_41 = arith.constant 0.000000e+00 : f32
    %69 = vector.broadcast %cst_41 : f32 to vector<16x128xf32>
    %70 = arith.maximumf %68, %69 : vector<16x128xf32>
    %71 = arith.addf %42, %70 : vector<16x128xf32>
    %72 = arith.truncf %71 : vector<16x128xf32> to vector<16x128xbf16>
    %c2_42 = arith.constant 2 : index
    %c0_43 = arith.constant 0 : index
    %c0_44 = arith.constant 0 : index
    %73 = vector.load %arg3[%c2_42, %c0_43, %c0_44] : memref<4x128x128xbf16, #tpu.memory_space<vmem>>, vector<1x128x128xbf16>
    %74 = vector.shape_cast %73 : vector<1x128x128xbf16> to vector<128x128xbf16>
    %cst_45 = arith.constant dense<0.000000e+00> : vector<16x128xf32>
    %75 = tpu.matmul %72, %74, %cst_45 {dimension_numbers = #tpu.dot_dimension_numbers<[1], [0], [0], [1], [0, 0, 1, 1], [], []>} : vector<16x128xbf16>, vector<128x128xbf16>, vector<16x128xf32> -> vector<16x128xf32>
    %c2_46 = arith.constant 2 : index
    %c0_47 = arith.constant 0 : index
    %76 = vector.load %arg4[%c2_46, %c0_47] : memref<8x128xf32, #tpu.memory_space<vmem>>, vector<1x128xf32>
    %77 = vector.broadcast %76 : vector<1x128xf32> to vector<16x128xf32>
    %78 = arith.addf %75, %77 : vector<16x128xf32>
    %cst_48 = arith.constant 0.000000e+00 : f32
    %79 = vector.broadcast %cst_48 : f32 to vector<16x128xf32>
    %80 = arith.maximumf %78, %79 : vector<16x128xf32>
    %81 = arith.truncf %80 : vector<16x128xf32> to vector<16x128xbf16>
    %c3_49 = arith.constant 3 : index
    %c0_50 = arith.constant 0 : index
    %c0_51 = arith.constant 0 : index
    %82 = vector.load %arg3[%c3_49, %c0_50, %c0_51] : memref<4x128x128xbf16, #tpu.memory_space<vmem>>, vector<1x128x128xbf16>
    %83 = vector.shape_cast %82 : vector<1x128x128xbf16> to vector<128x128xbf16>
    %cst_52 = arith.constant dense<0.000000e+00> : vector<16x128xf32>
    %84 = tpu.matmul %81, %83, %cst_52 {dimension_numbers = #tpu.dot_dimension_numbers<[1], [0], [0], [1], [0, 0, 1, 1], [], []>} : vector<16x128xbf16>, vector<128x128xbf16>, vector<16x128xf32> -> vector<16x128xf32>
    %c3_53 = arith.constant 3 : index
    %c0_54 = arith.constant 0 : index
    %85 = vector.load %arg4[%c3_53, %c0_54] : memref<8x128xf32, #tpu.memory_space<vmem>>, vector<1x128xf32>
    %86 = vector.broadcast %85 : vector<1x128xf32> to vector<16x128xf32>
    %87 = arith.addf %84, %86 : vector<16x128xf32>
    %88 = arith.mulf %13, %87 : vector<16x128xf32>
    %89 = arith.addf %71, %29 : vector<16x128xf32>
    %90 = arith.addf %89, %88 : vector<16x128xf32>
    %91 = arith.truncf %90 : vector<16x128xf32> to vector<16x128xbf16>
    %c2_55 = arith.constant 2 : index
    %c0_56 = arith.constant 0 : index
    %c0_57 = arith.constant 0 : index
    %92 = vector.load %arg5[%c2_55, %c0_56, %c0_57] : memref<3x128x128xbf16, #tpu.memory_space<vmem>>, vector<1x128x128xbf16>
    %93 = vector.shape_cast %92 : vector<1x128x128xbf16> to vector<128x128xbf16>
    %cst_58 = arith.constant dense<0.000000e+00> : vector<16x128xf32>
    %94 = tpu.matmul %91, %93, %cst_58 {dimension_numbers = #tpu.dot_dimension_numbers<[1], [0], [0], [1], [0, 0, 1, 1], [], []>} : vector<16x128xbf16>, vector<128x128xbf16>, vector<16x128xf32> -> vector<16x128xf32>
    %c2_59 = arith.constant 2 : index
    %c0_60 = arith.constant 0 : index
    %95 = vector.load %arg6[%c2_59, %c0_60] : memref<3x128xf32, #tpu.memory_space<vmem>>, vector<1x128xf32>
    %96 = vector.broadcast %95 : vector<1x128xf32> to vector<16x128xf32>
    %97 = arith.addf %94, %96 : vector<16x128xf32>
    %cst_61 = arith.constant 0.000000e+00 : f32
    %98 = vector.broadcast %cst_61 : f32 to vector<16x128xf32>
    %99 = arith.maximumf %97, %98 : vector<16x128xf32>
    %100 = arith.addf %71, %99 : vector<16x128xf32>
    %c0_62 = arith.constant 0 : index
    %c0_63 = arith.constant 0 : index
    %101 = vector.load %arg7[%c0_62, %c0_63] : memref<16x128xf32, #tpu.memory_space<vmem>>, vector<16x128xf32>
    tpu.vector_store %arg7[%c0_62, %c0_63], %100 {strides = array<i32>} : memref<16x128xf32, #tpu.memory_space<vmem>>, vector<16x128xf32>,
    return
  }
  func.func @transform_0(%arg0: i32) -> (i32, i32) {
    %c0_i32 = arith.constant 0 : i32
    %c0_i32_0 = arith.constant 0 : i32
    return %arg0, %c0_i32 : i32, i32
  }
  func.func @transform_1(%arg0: i32) -> (i32, i32) {
    %c0_i32 = arith.constant 0 : i32
    %c0_i32_0 = arith.constant 0 : i32
    return %arg0, %c0_i32 : i32, i32
  }
  func.func @transform_2(%arg0: i32) -> (i32, i32, i32) {
    %c0_i32 = arith.constant 0 : i32
    %c0_i32_0 = arith.constant 0 : i32
    %c0_i32_1 = arith.constant 0 : i32
    %c0_i32_2 = arith.constant 0 : i32
    return %c0_i32, %c0_i32_0, %c0_i32_1 : i32, i32, i32
  }
  func.func @transform_3(%arg0: i32) -> (i32, i32) {
    %c0_i32 = arith.constant 0 : i32
    %c0_i32_0 = arith.constant 0 : i32
    %c0_i32_1 = arith.constant 0 : i32
    return %c0_i32, %c0_i32_0 : i32, i32
  }
  func.func @transform_4(%arg0: i32) -> (i32, i32, i32) {
    %c0_i32 = arith.constant 0 : i32
    %c0_i32_0 = arith.constant 0 : i32
    %c0_i32_1 = arith.constant 0 : i32
    %c0_i32_2 = arith.constant 0 : i32
    return %c0_i32, %c0_i32_0, %c0_i32_1 : i32, i32, i32
  }
  func.func @transform_5(%arg0: i32) -> (i32, i32) {
    %c0_i32 = arith.constant 0 : i32
    %c0_i32_0 = arith.constant 0 : i32
    %c0_i32_1 = arith.constant 0 : i32
    return %c0_i32, %c0_i32_0 : i32, i32
  }
  func.func @transform_6(%arg0: i32) -> (i32, i32) {
    %c0_i32 = arith.constant 0 : i32
    %c0_i32_0 = arith.constant 0 : i32
    return %arg0, %c0_i32 : i32, i32
  }
}

</mosaic_0001>

<bundles_post_ra>
// kernel: tpu_custom_call.1
= control target key start
LH: loop header
LB: loop body
LE: loop exit
PB: predicated region body
PF: predicated region fallthrough
CT: control target
= control target key end

     0   :  { %11 = vsyncpa [#allocation3], 0  ;;  %s1841_s0 = inlined_call_operand.vmem [shape: f32[16,128], index: 0, kind: input, shape index: {}]   ;;  %s1842_s1 = inlined_call_operand.vmem [shape: f32[16,1], index: 1, kind: input, shape index: {}]   ;;  %s1843_s2 = inlined_call_operand.hbm [shape: bf16[4,128,128], index: 2, kind: input, shape index: {}]   ;;  %s1844_s3 = inlined_call_operand.hbm [shape: f32[8,128], index: 3, kind: input, shape index: {}]   ;;  %s1845_s4 = inlined_call_operand.hbm [shape: bf16[3,128,128], index: 4, kind: input, shape index: {}]   ;;  %s1846_s5 = inlined_call_operand.vmem [shape: f32[3,128], index: 5, kind: input, shape index: {}]   ;;  %s1847_s6 = inlined_call_operand.hbm [shape: f32[16,128], index: 6, kind: output, shape index: {}]  }
   0x1   :  { %12 = vsyncpa [#allocation6], 0  ;;  %s36_s23 = sshll.u32 %s1844_s3, 4  ;;  %s37_s23 = int_to_ptr.hbm [resolvable:$true] %s36_s23 }
   0x2   :  { %13 = vsyncpa [#allocation4], 0  ;;  %s1520_s24 = smov [#allocation5]   ;;  %s22_s28 = sshll.u32 %s1843_s2, 4  ;;  %s23_s28 = int_to_ptr.hbm [resolvable:$true] %s22_s28 }
   0x3   :  { %s38_s25 = sshll.u32 %s1520_s24, 4  ;;  %s1521_s29 = smov [#allocation2]   ;;  %s39_s25 = int_to_ptr.vmem [resolvable:$true] %s38_s25 }
   0x4   :  { %41 = dma.hbm_to_vmem [thread:$0]  %s37_s23, 128, %s39_s25, [#allocation6]  }
   0x5   :  { %s24_s30 = sshll.u32 %s1521_s29, 4  ;;  %s1522_s7 = smov 64   ;;  %s25_s30 = int_to_ptr.vmem [resolvable:$true] %s24_s30 }
   0x6   :  { %s1523_s8 = smov 4   ;;  %s46_s3 = sshll.u32 %s1845_s4, 4  ;;  %s47_s3 = int_to_ptr.hbm [resolvable:$true] %s46_s3 }
   0x7   :  { %30 = dma.hbm_to_vmem [thread:$0]  %s23_s28, 4096, %s25_s30, [#allocation3], %s1522_s7, %s1522_s7, %s1523_s8  }
   0x8   :  { %s1524_s11 = smov [#allocation7]  }
   0x9   :  { %s48_s12 = sshll.u32 %s1524_s11, 4  ;;  %s49_s12 = int_to_ptr.vmem [resolvable:$true] %s48_s12 }
   0xa   :  { %54 = dma.hbm_to_vmem [thread:$0]  %s47_s3, 3072, %s49_s12, [#allocation6], %s1522_s7, %s1522_s7, %s1523_s8  }
   0xb   :  { %1514 = dma.done.wait [#allocation3], 4096  }
   0xc   :  { %1515 = vsyncadd [#allocation3], 4294963200 }
   0xd   :  { %1516 = dma.done.wait [#allocation6], 3200  }
   0xe   :  { %1517 = vsyncadd [#allocation6], 4294964096  ;;  %v1525_v0 = vmov 0   ;;  %v69_v1 = vld [vmem:[%s1842_s1] sm:$0xff]  ;;  %v70_v2 = vld [vmem:[%s1842_s1 + $0x8] sm:$0xff]  ;;  %s1532_s23 = smov [#allocation8]  }
   0xf   :  { %1400 = vset.pattern.permute.xlu0 %v1525_v0  ;;  %v1097_v3 = vmul.f32 -1.442695, %v69_v1  ;;  %v1098_v4 = vmul.f32 -1.442695, %v70_v2  ;;  %v1401_v29 = vld [vmem:[#allocation5 + $0x4] ss:$0 sm:$0xff] }
  0x10   :  { %v1402_v30 = vld [vmem:[#allocation5 + $0x5] ss:$0 sm:$0xff]  ;;  %v1526_v51 = vmov 683565275   ;;  %v1527_v53 = vmov 2475754826  }
  0x11   :  { %1410 = vpow2.f32 %v1097_v3  ;;  %v1528_v57 = vmov 2131351028   ;;  %v1529_v60 = vmov 2102212464   ;;  %v1336_v62 = vld [vmem:[#allocation2 + $0x38] sm:$0xff]  ;;  %s1081_s24 = sshll.u32 %s1532_s23, 4  ;;  %s1082_s24 = int_to_ptr.vmem [resolvable:$true] %s1081_s24 }
  0x12   :  { %1412 = vpow2.f32 %v1098_v4  ;;  %v1530_v1 = vmov 920167782   ;;  %v1531_v4 = vmov 1326507024   ;;  %504 = vmatpush.bf16.msra.mxu0 %v1336_v62  ;;  %s1083_s27 = sshll.u32 %s1847_s6, 4  ;;  %s1533_s28 = smov 128   ;;  %s1084_s27 = int_to_ptr.hbm [resolvable:$true] %s1083_s27 }
  0x17   :  { %v1411_v5 = vpop.eup %1410 }
  0x18   :  { %v1413_v6 = vpop.eup %1412  ;;  %v77_v7 = vadd.f32 1.0, %v1411_v5 }
  0x19   :  { %v78_v8 = vadd.f32 1.0, %v1413_v6 }
  0x1a   :  { %1414 = vrcp.f32 %v77_v7  ;;  %v90_v12 = vand.u32 2147483648, %v77_v7  ;;  %vm84_vm0 = vweird.f32 %v77_v7  ;;  %v88_v15 = vand.u32 2147483647, %v77_v7 }
  0x1b   :  { %1416 = vrcp.f32 %v78_v8  ;;  %vm99_vm4 = vweird.f32 %v78_v8  ;;  %v105_v21 = vand.u32 2147483648, %v78_v8  ;;  %v103_v24 = vand.u32 2147483647, %v78_v8 }
  0x1c   :  { %v91_v18 = vor.u32 1.1754944e-38, %v90_v12  ;;  %vm89_vm3 = vcmp.eq.f32.partialorder %v88_v15, 8.507059e+37 }
  0x1d   :  { %v106_v26 = vor.u32 1.1754944e-38, %v105_v21  ;;  %vm104_vm7 = vcmp.eq.f32.partialorder %v103_v24, 8.507059e+37 }
  0x20   :  { %v1415_v9 = vpop.eup %1414 }
  0x21   :  { %v1417_v10 = vpop.eup %1416  ;;  %v80_v11 = vmul.f32 %v1415_v9, %v77_v7  ;;  %vm85_vm1 = vweird.f32 %v1415_v9 }
  0x22   :  { %v95_v13 = vmul.f32 %v1417_v10, %v78_v8  ;;  %vm86_vm2 = vmor %vm84_vm0, %vm85_vm1  ;;  %vm100_vm5 = vweird.f32 %v1417_v10 }
  0x23   :  { %v81_v14 = vsub.f32 1.0, %v80_v11  ;;  %vm101_vm6 = vmor %vm99_vm4, %vm100_vm5 }
  0x24   :  { %v96_v16 = vsub.f32 1.0, %v95_v13 }
  0x25   :  { %v82_v17 = vmul.f32 %v1415_v9, %v81_v14 }
  0x26   :  { %v97_v19 = vmul.f32 %v1417_v10, %v96_v16 }
  0x27   :  { %v83_v20 = vadd.f32 %v1415_v9, %v82_v17 }
  0x28   :  { %v98_v23 = vadd.f32 %v1417_v10, %v97_v19 }
  0x29   :  { %v87_v22 = vsel %vm86_vm2, %v1415_v9, %v83_v20 }
  0x2a   :  { %v92_v25 = vsel %vm89_vm3, %v91_v18, %v87_v22  ;;  %v102_v27 = vsel %vm101_vm6, %v1417_v10, %v98_v23  ;;  %v1335_v10 = vld [vmem:[#allocation2 + $0x30] sm:$0xff]  ;;  %v1334_v22 = vld [vmem:[#allocation2 + $0x28] sm:$0xff] }
  0x2b   :  { %112 = vperm.xlu0 %1400, %v92_v25   ;;  %v107_v28 = vsel %vm104_vm7, %v106_v26, %v102_v27  ;;  %505 = vmatpush.bf16.msra.mxu0 %v1335_v10 }
  0x2f   :  { %506 = vmatpush.bf16.msra.mxu0 %v1334_v22 }
  0x33   :  { %117 = vperm.xlu0 %1400, %v107_v28  }
  0x9d   :  { %v113_v31 = vpop.permute.xlu0 %112 }
  0x9e   :  { %v121_v32 = vmul.f32 %v1401_v29, %v113_v31 }
  0xa0   :  { %v1586_v33 = vadd.f32 %v1402_v30, %v121_v32 }
  0xa2   :  { %v130_v34 = vand.u32 2139095040, %v1586_v33  ;;  %v127_v37 = vand.u32 2147483647, %v1586_v33 }
  0xa4   :  { %v131_v35 = vshrl.u32 %v130_v34, 23  ;;  %v134_v42 = vand.u32 8388607, %v127_v37  ;;  %v1333_v34 = vld [vmem:[#allocation2 + $0x20] sm:$0xff] }
  0xa5   :  { %v118_v36 = vpop.permute.xlu0 %117  ;;  %507 = vmatpush.bf16.msra.mxu0 %v1333_v34 }
  0xa6   :  { %v1099_v38 = vadd.s32 4294967169, %v131_v35  ;;  %v122_v39 = vmul.f32 %v1401_v29, %v118_v36  ;;  %v135_v47 = vor.u32 8388608, %v134_v42 }
  0xa8   :  { %v137_v40 = vadd.s32 1, %v1099_v38  ;;  %v1590_v41 = vadd.f32 %v1402_v30, %v122_v39  ;;  %v1615_v14 = vshll.u32 %v135_v47, 8 }
  0xaa   :  { %vm138_vm8 = vcmp.gt.s32.totalorder %v137_v40, 0  ;;  %v282_v44 = vand.u32 2147483647, %v1590_v41  ;;  %v285_v45 = vand.u32 2139095040, %v1590_v41  ;;  %v1627_v25 = vand.u32 65535, %v1615_v14 }
  0xab   :  { %v139_v43 = vsel %vm138_vm8, %v137_v40, 0  ;;  %v1644_v38 = vshrl.u32 %v1615_v14, 16 }
  0xac   :  { %v141_v46 = vand.u32 31, %v139_v43  ;;  %v286_v49 = vshrl.u32 %v285_v45, 23  ;;  %v1596_v50 = vshrl.u32 %v139_v43, 5  ;;  %v289_v55 = vand.u32 8388607, %v282_v44 }
  0xae   :  { %v142_v48 = vsub.s32 32, %v141_v46  ;;  %v144_v52 = vshll.u32 %v1526_v51, %v141_v46  ;;  %v147_v54 = vshll.u32 %v1527_v53, %v141_v46  ;;  %v150_v59 = vshll.u32 %v1528_v57, %v141_v46 }
  0xaf   :  { %v153_v63 = vshll.u32 %v1529_v60, %v141_v46  ;;  %v156_v3 = vshll.u32 %v1530_v1, %v141_v46  ;;  %v1102_v9 = vadd.s32 4294967169, %v286_v49  ;;  %vm159_vm9 = vcmp.lt.s32.totalorder %v1596_v50, 1 }
  0xb0   :  { %v145_v56 = vshrl.u32 %v1527_v53, %v142_v48  ;;  %v148_v58 = vshrl.u32 %v1528_v57, %v142_v48  ;;  %v151_v61 = vshrl.u32 %v1529_v60, %v142_v48  ;;  %v154_v2 = vshrl.u32 %v1530_v1, %v142_v48 }
  0xb1   :  { %v157_v5 = vshrl.u32 %v1531_v4, %v142_v48  ;;  %vm161_vm10 = vcmp.lt.s32.totalorder %v1596_v50, 3  ;;  %vm162_vm11 = vcmp.lt.s32.totalorder %v1596_v50, 4  ;;  %v290_v17 = vor.u32 8388608, %v289_v55  ;;  %v1332_v55 = vld [vmem:[#allocation2 + $0x18] sm:$0xff] }
  0xb2   :  { %v146_v6 = vor.u32 %v145_v56, %v144_v52  ;;  %v149_v7 = vor.u32 %v148_v58, %v147_v54  ;;  %v152_v8 = vor.u32 %v151_v61, %v150_v59  ;;  %v155_v11 = vor.u32 %v154_v2, %v153_v63  ;;  %508 = vmatpush.bf16.msra.mxu0 %v1332_v55 }
  0xb3   :  { %v158_v12 = vor.u32 %v157_v5, %v156_v3  ;;  %v292_v18 = vadd.s32 1, %v1102_v9  ;;  %vm160_vm12 = vcmp.lt.s32.totalorder %v1596_v50, 2  ;;  %v143_v28 = vshrl.u32 %v1526_v51, %v142_v48 }
  0xb4   :  { %v171_v13 = vsel %vm159_vm9, %v149_v7, %v152_v8  ;;  %v168_v15 = vsel %vm162_vm11, %v155_v11, 920167782  ;;  %v167_v19 = vsel %vm159_vm9, %v146_v6, %v149_v7  ;;  %v164_v24 = vsel %vm162_vm11, %v152_v8, 2102212464 }
  0xb5   :  { %v172_v16 = vsel %vm162_vm11, %v158_v12, 1326507024  ;;  %v169_v20 = vsel %vm161_vm10, %v152_v8, %v168_v15  ;;  %vm293_vm13 = vcmp.gt.s32.totalorder %v292_v18, 0  ;;  %v1634_v31 = vshll.u32 %v290_v17, 8 }
  0xb6   :  { %v173_v21 = vsel %vm161_vm10, %v155_v11, %v172_v16  ;;  %v1632_v29 = vsel %vm160_vm12, %v167_v19, %v169_v20  ;;  %v294_v30 = vsel %vm293_vm13, %v292_v18, 0  ;;  %v163_v35 = vsel %vm159_vm9, %v143_v28, %v146_v6  ;;  %v1330_v20 = vld [vmem:[#allocation2 + $0x8] sm:$0xff] }
  0xb7   :  { %v174_v23 = vsel %vm160_vm12, %v171_v13, %v173_v21  ;;  %v165_v36 = vsel %vm161_vm10, %v149_v7, %v164_v24  ;;  %v200_v42 = vand.u32 65535, %v1632_v29  ;;  %v296_v43 = vand.u32 31, %v294_v30 }
  0xb8   :  { %v178_v26 = vand.u32 65535, %v174_v23  ;;  %v179_v27 = vshrl.u32 %v174_v23, 16  ;;  %v201_v46 = vshrl.u32 %v1632_v29, 16  ;;  %v1654_v47 = vand.u32 65535, %v1634_v31 }
  0xb9   :  { %v1657_v48 = vshrl.u32 %v1634_v31, 16  ;;  %v1660_v52 = vshrl.u32 %v294_v30, 5  ;;  %v1662_v54 = vsub.s32 32, %v296_v43  ;;  %v299_v59 = vshll.u32 %v1526_v51, %v296_v43 }
  0xba   :  { %v1637_v32 = vmul.u32 %v179_v27, %v1627_v25  ;;  %v180_v39 = vmul.u32 %v178_v26, %v1627_v25  ;;  %v1650_v45 = vmul.u32 %v178_v26, %v1644_v38  ;;  %v183_v49 = vmul.u32 %v179_v27, %v1644_v38 }
  0xbb   :  { %v302_v61 = vshll.u32 %v1527_v53, %v296_v43  ;;  %v300_v62 = vshrl.u32 %v1527_v53, %v1662_v54  ;;  %v303_v63 = vshrl.u32 %v1528_v57, %v1662_v54  ;;  %v305_v2 = vshll.u32 %v1528_v57, %v296_v43  ;;  %v1331_v57 = vld [vmem:[#allocation2 + $0x10] sm:$0xff] }
  0xbc   :  { %v184_v40 = vshll.u32 %v1637_v32, 16  ;;  %v308_v3 = vshll.u32 %v1529_v60, %v296_v43  ;;  %v306_v5 = vshrl.u32 %v1529_v60, %v1662_v54  ;;  %v309_v6 = vshrl.u32 %v1530_v1, %v1662_v54  ;;  %509 = vmatpush.bf16.msra.mxu0 %v1331_v57 }
  0xbd   :  { %v311_v7 = vshll.u32 %v1530_v1, %v296_v43  ;;  %v312_v8 = vshrl.u32 %v1531_v4, %v1662_v54  ;;  %v186_v53 = vshll.u32 %v1650_v45, 16  ;;  %v1681_v10 = vor.u32 %v300_v62, %v299_v59 }
  0xbe   :  { %vm188_vm14 = vc.u32 %v180_v39, %v184_v40  ;;  %v190_v58 = vadd.s32 %v184_v40, %v180_v39  ;;  %v1683_v11 = vor.u32 %v303_v63, %v302_v61  ;;  %v1685_v12 = vor.u32 %v306_v5, %v305_v2 }
  0xbf   :  { %v189_v56 = vsel %vm188_vm14, 1, %v1525_v0  ;;  %v310_v60 = vor.u32 %v309_v6, %v308_v3  ;;  %v313_v13 = vor.u32 %v312_v8, %v311_v7  ;;  %vm314_vm15 = vcmp.lt.s32.totalorder %v1660_v52, 1 }
  0xc0   :  { %v191_v9 = vadd.s32 %v189_v56, %v183_v49  ;;  %v1689_v1 = vmul.u32 %v201_v46, %v1627_v25  ;;  %vm317_vm0 = vcmp.lt.s32.totalorder %v1660_v52, 4  ;;  %v322_v4 = vsel %vm314_vm15, %v1681_v10, %v1683_v11  ;;  %510 = vmatpush.bf16.msra.mxu0 %v1330_v20 }
  0xc1   :  { %vm192_vm1 = vc.u32 %v190_v58, %v186_v53  ;;  %vm316_vm2 = vcmp.lt.s32.totalorder %v1660_v52, 3  ;;  %v323_v15 = vsel %vm317_vm0, %v310_v60, 920167782  ;;  %v326_v16 = vsel %vm314_vm15, %v1683_v11, %v1685_v12  ;;  %v1329_v58 = vld [vmem:[#allocation2] sm:$0xff] }
  0xc2   :  { %v327_v17 = vsel %vm317_vm0, %v313_v13, 1326507024  ;;  %vm315_vm3 = vcmp.lt.s32.totalorder %v1660_v52, 2  ;;  %v324_v18 = vsel %vm316_vm2, %v1685_v12, %v323_v15  ;;  %v193_v21 = vsel %vm192_vm1, 1, %v1525_v0 }
  0xc3   :  { %v328_v19 = vsel %vm316_vm2, %v310_v60, %v327_v17  ;;  %v204_v22 = vmul.u32 %v200_v42, %v1644_v38  ;;  %v325_v23 = vsel %vm315_vm3, %v322_v4, %v324_v18  ;;  %v195_v26 = vadd.s32 %v193_v21, %v191_v9 }
  0xc4   :  { %v329_v24 = vsel %vm315_vm3, %v326_v16, %v328_v19  ;;  %v356_v29 = vshrl.u32 %v325_v23, 16  ;;  %v206_v30 = vshll.u32 %v1689_v1, 16  ;;  %v1720_v34 = vsel %vm160_vm12, %v163_v35, %v165_v36  ;;  %511 = vmatpush.bf16.msra.mxu0 %v1329_v58 }
  0xc5   :  { %v333_v27 = vand.u32 65535, %v329_v24  ;;  %v334_v28 = vshrl.u32 %v329_v24, 16  ;;  %v355_v39 = vand.u32 65535, %v325_v23  ;;  %v185_v40 = vshrl.u32 %v1637_v32, 16 }
  0xc6   :  { %v202_v43 = vmul.u32 %v200_v42, %v1627_v25  ;;  %v205_v49 = vmul.u32 %v201_v46, %v1644_v38  ;;  %v358_v59 = vmul.u32 %v356_v29, %v1654_v47  ;;  %v187_v61 = vshrl.u32 %v1650_v45, 16 }
  0xc7   :  { %v336_v55 = vmul.u32 %v334_v28, %v1654_v47  ;;  %v337_v56 = vmul.u32 %v333_v27, %v1657_v48  ;;  %v196_v50 = vadd.s32 %v195_v26, %v185_v40  ;;  %v208_v35 = vshll.u32 %v204_v22, 16 }
  0xc8   :  { %v335_v36 = vmul.u32 %v333_v27, %v1654_v47  ;;  %v338_v32 = vmul.u32 %v334_v28, %v1657_v48  ;;  %vm210_vm4 = vc.u32 %v202_v43, %v206_v30  ;;  %v359_v38 = vmul.u32 %v355_v39, %v1657_v48 }
  0xc9   :  { %v339_v62 = vshll.u32 %v336_v55, 16  ;;  %v341_v25 = vshll.u32 %v337_v56, 16  ;;  %v211_v42 = vsel %vm210_vm4, 1, %v1525_v0  ;;  %v212_v46 = vadd.s32 %v206_v30, %v202_v43 }
  0xca   :  { %v213_v2 = vadd.s32 %v211_v42, %v205_v49  ;;  %v361_v3 = vshll.u32 %v358_v59, 16  ;;  %v357_v5 = vmul.u32 %v355_v39, %v1654_v47  ;;  %v207_v6 = vshrl.u32 %v1689_v1, 16 }
  0xcb   :  { %vm343_vm5 = vc.u32 %v335_v36, %v339_v62  ;;  %v345_v63 = vadd.s32 %v339_v62, %v335_v36  ;;  %vm214_vm6 = vc.u32 %v212_v46, %v208_v35  ;;  %v360_v8 = vmul.u32 %v356_v29, %v1657_v48 }
  0xcc   :  { %v344_v45 = vsel %vm343_vm5, 1, %v1525_v0  ;;  %v215_v53 = vsel %vm214_vm6, 1, %v1525_v0  ;;  %v197_v9 = vadd.s32 %v196_v50, %v187_v61  ;;  %v340_v60 = vshrl.u32 %v336_v55, 16 }
  0xcd   :  { %v346_v7 = vadd.s32 %v344_v45, %v338_v32  ;;  %vm347_vm7 = vc.u32 %v345_v63, %v341_v25  ;;  %v217_v57 = vadd.s32 %v215_v53, %v213_v2  ;;  %v363_v15 = vshll.u32 %v359_v38, 16 }
  0xce   :  { %v348_v13 = vsel %vm347_vm7, 1, %v1525_v0  ;;  %vm365_vm8 = vc.u32 %v357_v5, %v361_v3  ;;  %v367_v16 = vadd.s32 %v361_v3, %v357_v5  ;;  %v319_v47 = vsel %vm317_vm0, %v1685_v12, 2102212464 }
  0xcf   :  { %v350_v4 = vadd.s32 %v348_v13, %v346_v7  ;;  %v209_v1 = vshrl.u32 %v204_v22, 16  ;;  %v218_v17 = vadd.s32 %v217_v57, %v207_v6  ;;  %v366_v48 = vsel %vm365_vm8, 1, %v1525_v0 }
  0xd0   :  { %v216_v18 = vadd.s32 %v212_v46, %v208_v35  ;;  %v368_v20 = vadd.s32 %v366_v48, %v360_v8  ;;  %vm369_vm9 = vc.u32 %v367_v16, %v363_v15  ;;  %v298_v21 = vshrl.u32 %v1526_v51, %v1662_v54 }
  0xd1   :  { %v351_v19 = vadd.s32 %v350_v4, %v340_v60  ;;  %v219_v23 = vadd.s32 %v218_v17, %v209_v1  ;;  %v342_v24 = vshrl.u32 %v337_v56, 16  ;;  %v370_v26 = vsel %vm369_vm9, 1, %v1525_v0 }
  0xd2   :  { %vm222_vm10 = vc.u32 %v197_v9, %v216_v18  ;;  %v362_v27 = vshrl.u32 %v358_v59, 16  ;;  %v372_v28 = vadd.s32 %v370_v26, %v368_v20  ;;  %v318_v12 = vsel %vm314_vm15, %v298_v21, %v1681_v10 }
  0xd3   :  { %v320_v22 = vsel %vm316_vm2, %v1683_v11, %v319_v47  ;;  %v223_v29 = vadd.s32 1, %v219_v23  ;;  %v352_v30 = vadd.s32 %v351_v19, %v342_v24  ;;  %v220_v51 = vmul.u32 %v1615_v14, %v1720_v34  ;;  %v1344_v24 = vld [vmem:[#allocation2 + $0x78] sm:$0xff] }
  0xd4   :  { %v364_v54 = vshrl.u32 %v359_v38, 16  ;;  %v373_v39 = vadd.s32 %v372_v28, %v362_v27  ;;  %v371_v0 = vadd.s32 %v367_v16, %v363_v15  ;;  %v321_v43 = vsel %vm315_vm3, %v318_v12, %v320_v22  ;;  %588 = vmatpush.bf16.msra.mxu1 %v1344_v24  ;;  %v1343_v22 = vld [vmem:[#allocation2 + $0x70] sm:$0xff]  ;;  %v1340_v28 = vld [vmem:[#allocation2 + $0x58] sm:$0xff] }
  0xd5   :  { %v224_v40 = vsel %vm222_vm10, %v223_v29, %v219_v23  ;;  %v375_v58 = vmul.u32 %v1634_v31, %v321_v43  ;;  %v221_v2 = vadd.s32 %v216_v18, %v197_v9  ;;  %vm129_vm0 = vcmp.lt.s32.totalorder %v1586_v33, 0 }
  0xd6   :  { %v225_v49 = vadd.s32 %v224_v40, %v220_v51  ;;  %v374_v55 = vadd.s32 %v373_v39, %v364_v54  ;;  %vm377_vm11 = vc.u32 %v352_v30, %v371_v0  ;;  %v376_v13 = vadd.s32 %v371_v0, %v352_v30  ;;  %v1342_v0 = vld [vmem:[#allocation2 + $0x68] sm:$0xff] }
  0xd7   :  { %vm1766_vm1 = vcmp.le.f32.partialorder %v127_v37, 0.7853982  ;;  %vm284_vm2 = vcmp.lt.s32.totalorder %v1590_v41, 0  ;;  %vm1782_vm3 = vcmp.le.f32.partialorder %v282_v44, 0.7853982  ;;  %vm270_vm10 = vweird.f32 %v1586_v33 }
  0xd8   :  { %v226_v10 = vadd.s32 536870912, %v225_v49  ;;  %v378_v56 = vadd.s32 1, %v374_v55  ;;  %589 = vmatpush.bf16.msra.mxu1 %v1343_v22  ;;  %v1338_v22 = vld [vmem:[#allocation2 + $0x48] sm:$0xff] }
  0xda   :  { %v1757_v11 = vshrl.u32 %v226_v10, 30  ;;  %v379_v59 = vsel %vm377_vm11, %v378_v56, %v374_v55  ;;  %vm425_vm11 = vweird.f32 %v1590_v41 }
  0xdb   :  { %v380_v61 = vadd.s32 %v379_v59, %v375_v58 }
  0xdc   :  { %v228_v14 = vshll.u32 %v1757_v11, 30  ;;  %v251_v29 = vsub.s32 4, %v1757_v11  ;;  %590 = vmatpush.bf16.msra.mxu1 %v1342_v0 }
  0xdd   :  { %v381_v34 = vadd.s32 536870912, %v380_v61 }
  0xde   :  { %v229_v50 = vsub.s32 %v225_v49, %v228_v14  ;;  %v252_v43 = vsel %vm129_vm0, %v251_v29, %v1757_v11  ;;  %v1337_v29 = vld [vmem:[#allocation2 + $0x40] sm:$0xff] }
  0xdf   :  { %v1760_v35 = vshrl.u32 %v381_v34, 30  ;;  %v1341_v34 = vld [vmem:[#allocation2 + $0x60] sm:$0xff]  ;;  %v254_v44 = vsel %vm1766_vm1, 0, %v252_v43 }
  0xe0   :  { %vm230_vm12 = vcmp.lt.s32.totalorder %v229_v50, 0  ;;  %v231_v52 = vsub.s32 0, %v229_v50  ;;  %591 = vmatpush.bf16.msra.mxu1 %v1341_v34  ;;  %v1357_v34 = vld [vmem:[#allocation2 + $0xa0] sm:$0xff] }
  0xe1   :  { %v383_v36 = vshll.u32 %v1760_v35, 30  ;;  %v406_v58 = vsub.s32 4, %v1760_v35 }
  0xe2   :  { %v232_v32 = vsel %vm230_vm12, %v231_v52, %v229_v50 }
  0xe3   :  { %v233_v62 = vclz %v232_v32  ;;  %v384_v25 = vsub.s32 %v380_v61, %v383_v36 }
  0xe4   :  { %592 = vmatpush.bf16.msra.mxu1 %v1340_v28 }
  0xe5   :  { %v1100_v38 = vadd.s32 4294967294, %v233_v62  ;;  %vm385_vm13 = vcmp.lt.s32.totalorder %v384_v25, 0  ;;  %v386_v31 = vsub.s32 0, %v384_v25  ;;  %v407_v62 = vsel %vm284_vm2, %v406_v58, %v1760_v35  ;;  %v1346_v58 = vld [vmem:[#allocation7 + $0x8] sm:$0xff] }
  0xe7   :  { %vm1101_vm14 = vcmp.lt.s32.totalorder %v1100_v38, 0  ;;  %v387_v42 = vsel %vm385_vm13, %v386_v31, %v384_v25 }
  0xe8   :  { %v236_v46 = vsel %vm1101_vm14, 0, %v1100_v38  ;;  %v388_v63 = vclz %v387_v42 }
  0xe9   :  { %v237_v3 = vsub.s32 32, %v236_v46  ;;  %v241_v45 = vsub.s32 4294967266, %v236_v46  ;;  %v238_v6 = vshll.u32 %v229_v50, %v236_v46  ;;  %v271_v46 = vadd.s32 3, %v254_v44 }
  0xea   :  { %v1103_v5 = vadd.s32 4294967294, %v388_v63  ;;  %v409_v63 = vsel %vm1782_vm3, 0, %v407_v62  ;;  %v603_v62 = vld [vmem:[%s1841_s0 + $0x8] sm:$0xff] }
  0xeb   :  { %v239_v7 = vshrl.u32 %v221_v2, %v237_v3  ;;  %v242_v8 = vadd.s32 127, %v241_v45 }
  0xec   :  { %vm1104_vm15 = vcmp.lt.s32.totalorder %v1103_v5, 0 }
  0xed   :  { %v240_v53 = vor.u32 %v239_v7, %v238_v6  ;;  %v243_v57 = vshll.u32 %v242_v8, 23  ;;  %v391_v60 = vsel %vm1104_vm15, 0, %v1103_v5 }
  0xee   :  { %v392_v4 = vsub.s32 32, %v391_v60  ;;  %v396_v15 = vsub.s32 4294967266, %v391_v60  ;;  %v393_v47 = vshll.u32 %v384_v25, %v391_v60 }
  0xef   :  { %v244_v16 = vor.u32 4788187, %v243_v57  ;;  %v247_v19 = vcvt.s32.f32 %v240_v53  ;;  %v272_v53 = vand.u32 3, %v271_v46  ;;  %v426_v57 = vadd.s32 3, %v409_v63 }
  0xf0   :  { %v394_v1 = vshrl.u32 %v376_v13, %v392_v4  ;;  %v397_v17 = vadd.s32 127, %v396_v15 }
  0xf1   :  { %v245_v48 = vand.u32 2147483647, %v244_v16  ;;  %vm274_vm4 = vcmp.eq.s32.totalorder %v272_v53, 0  ;;  %vm277_vm5 = vcmp.eq.s32.totalorder %v272_v53, 2  ;;  %vm273_vm6 = vcmp.lt.s32.totalorder %v272_v53, 2  ;;  %v1365_v53 = vld [vmem:[#allocation2 + $0xe0] sm:$0xff] }
  0xf2   :  { %v395_v9 = vor.u32 %v394_v1, %v393_v47  ;;  %v398_v18 = vshll.u32 %v397_v17, 23  ;;  %v427_v47 = vand.u32 3, %v426_v57 }
  0xf3   :  { %v248_v20 = vmul.f32 %v247_v19, %v245_v48 }
  0xf4   :  { %v399_v21 = vor.u32 4788187, %v398_v18  ;;  %v402_v27 = vcvt.s32.f32 %v395_v9  ;;  %vm429_vm7 = vcmp.eq.s32.totalorder %v427_v47, 0  ;;  %vm432_vm8 = vcmp.eq.s32.totalorder %v427_v47, 2 }
  0xf5   :  { %v249_v23 = vxor.u32 2147483648, %v248_v20  ;;  %vm428_vm9 = vcmp.lt.s32.totalorder %v427_v47, 2 }
  0xf6   :  { %v400_v26 = vand.u32 2147483647, %v399_v21 }
  0xf7   :  { %v250_v12 = vsel %vm129_vm0, %v249_v23, %v248_v20 }
  0xf8   :  { %v253_v30 = vsel %vm1766_vm1, %v1586_v33, %v250_v12  ;;  %v403_v51 = vmul.f32 %v402_v27, %v400_v26  ;;  %v1339_v12 = vld [vmem:[#allocation2 + $0x50] sm:$0xff]  ;;  %v1352_v33 = vld [vmem:[#allocation7 + $0x38] sm:$0xff] }
  0xf9   :  { %v255_v54 = vmul.f32 %v253_v30, %v253_v30  ;;  %593 = vmatpush.bf16.msra.mxu1 %v1339_v12  ;;  %675 = vmatpush.bf16.msra.mxu2 %v1352_v33  ;;  %v1406_v12 = vld [vmem:[#allocation5 + $0x2] ss:$0 sm:$0xff] }
  0xfa   :  { %v404_v39 = vxor.u32 2147483648, %v403_v51 }
  0xfb   :  { %v256_v37 = vmul.f32 -0.001358992, %v255_v54  ;;  %v263_v40 = vmul.f32 -0.00019511016, %v255_v54 }
  0xfc   :  { %v405_v55 = vsel %vm284_vm2, %v404_v39, %v403_v51  ;;  %v1349_v51 = vld [vmem:[#allocation7 + $0x20] sm:$0xff]  ;;  %v1403_v39 = vld [vmem:[#allocation5] ss:$0 sm:$0xff] }
  0xfd   :  { %v257_v10 = vadd.f32 0.041655596, %v256_v37  ;;  %v264_v56 = vadd.f32 0.008332121, %v263_v40  ;;  %v408_v59 = vsel %vm1782_vm3, %v1590_v41, %v405_v55  ;;  %594 = vmatpush.bf16.msra.mxu1 %v1338_v22  ;;  %v1351_v41 = vld [vmem:[#allocation7 + $0x30] sm:$0xff] }
  0xfe   :  { %v410_v61 = vmul.f32 %v408_v59, %v408_v59  ;;  %676 = vmatpush.bf16.msra.mxu2 %v1351_v41 }
  0xff   :  { %v258_v14 = vmul.f32 %v257_v10, %v255_v54  ;;  %v265_v11 = vmul.f32 %v264_v56, %v255_v54  ;;  %v1348_v10 = vld [vmem:[#allocation7 + $0x18] sm:$0xff]  ;;  %v1347_v56 = vld [vmem:[#allocation7 + $0x10] sm:$0xff] }
 0x100   :  { %v411_v50 = vmul.f32 -0.001358992, %v410_v61  ;;  %v418_v52 = vmul.f32 -0.00019511016, %v410_v61 }
 0x101   :  { %v259_v36 = vadd.f32 -0.4999988, %v258_v14  ;;  %v266_v32 = vadd.f32 -0.16666654, %v265_v11  ;;  %595 = vmatpush.bf16.msra.mxu1 %v1337_v29  ;;  %v1359_v14 = vld [vmem:[#allocation2 + $0xb0] sm:$0xff]  ;;  %v1358_v11 = vld [vmem:[#allocation2 + $0xa8] sm:$0xff] }
 0x102   :  { %v412_v25 = vadd.f32 0.041655596, %v411_v50  ;;  %v419_v38 = vadd.f32 0.008332121, %v418_v52  ;;  %v1404_v50 = vld [vmem:[#allocation5 + $0x1] ss:$0 sm:$0xff] }
 0x103   :  { %v260_v31 = vmul.f32 %v259_v36, %v255_v54  ;;  %v267_v42 = vmul.f32 %v266_v32, %v255_v54  ;;  %v602_v36 = vld [vmem:[%s1841_s0] sm:$0xff] }
 0x104   :  { %v413_v2 = vmul.f32 %v412_v25, %v410_v61  ;;  %v420_v3 = vmul.f32 %v419_v38, %v410_v61 }
 0x105   :  { %v268_v45 = vadd.f32 1.0, %v267_v42  ;;  %v261_v5 = vadd.f32 1.0, %v260_v31 }
 0x106   :  { %v414_v6 = vadd.f32 -0.4999988, %v413_v2  ;;  %v421_v7 = vadd.f32 -0.16666654, %v420_v3  ;;  %v1356_v2 = vld [vmem:[#allocation2 + $0x98] sm:$0xff]  ;;  %v1355_v3 = vld [vmem:[#allocation2 + $0x90] sm:$0xff] }
 0x107   :  { %v269_v8 = vmul.f32 %v268_v45, %v253_v30  ;;  %v278_v4 = vxor.u32 2147483648, %v261_v5  ;;  %v1350_v30 = vld [vmem:[#allocation7 + $0x28] sm:$0xff]  ;;  %v1354_v45 = vld [vmem:[#allocation2 + $0x88] sm:$0xff] }
 0x108   :  { %v415_v60 = vmul.f32 %v414_v6, %v410_v61  ;;  %v422_v35 = vmul.f32 %v421_v7, %v410_v61  ;;  %677 = vmatpush.bf16.msra.mxu2 %v1350_v30  ;;  %v1360_v61 = vld [vmem:[#allocation2 + $0xb8] sm:$0xff]  ;;  %v1367_v7 = vld [vmem:[#allocation2 + $0xf0] sm:$0xff] }
 0x109   :  { %v275_v13 = vxor.u32 2147483648, %v269_v8  ;;  %v279_v19 = vsel %vm277_vm5, %v278_v4, %v269_v8  ;;  %761 = vmatpush.bf16.msra.mxu3 %v1360_v61  ;;  %v1368_v6 = vld [vmem:[#allocation2 + $0xf8] sm:$0xff]  ;;  %v1366_v8 = vld [vmem:[#allocation2 + $0xe8] sm:$0xff] }
 0x10a   :  { %v416_v15 = vadd.f32 1.0, %v415_v60  ;;  %v423_v16 = vadd.f32 1.0, %v422_v35  ;;  %845 = vmatpush.bf16.msrb.mxu0 %v1368_v6  ;;  %v1405_v60 = vld [vmem:[%s1846_s5] ss:$0 sm:$0xff] }
 0x10b   :  { %v276_v1 = vsel %vm274_vm4, %v261_v5, %v275_v13  ;;  %v1353_v5 = vld [vmem:[#allocation2 + $0x80] sm:$0xff] }
 0x10c   :  { %v424_v17 = vmul.f32 %v423_v16, %v408_v59  ;;  %v433_v48 = vxor.u32 2147483648, %v416_v15  ;;  %v280_v18 = vsel %vm273_vm6, %v276_v1, %v279_v19  ;;  %678 = vmatpush.bf16.msra.mxu2 %v1349_v51  ;;  %v1345_v59 = vld [vmem:[#allocation7] sm:$0xff]  ;;  %v1363_v19 = vld [vmem:[#allocation2 + $0xd0] sm:$0xff] }
 0x10d   :  { %v1801_v24 = vsel %vm270_vm10, nan, %v280_v18  ;;  %762 = vmatpush.bf16.msra.mxu3 %v1359_v14  ;;  %v1361_v18 = vld [vmem:[#allocation2 + $0xc0] sm:$0xff] }
 0x10e   :  { %v430_v9 = vxor.u32 2147483648, %v424_v17  ;;  %v434_v21 = vsel %vm432_vm8, %v433_v48, %v424_v17  ;;  %846 = vmatpush.bf16.msrb.mxu0 %v1367_v7  ;;  %v1364_v48 = vld [vmem:[#allocation2 + $0xd8] sm:$0xff] }
 0x110   :  { %v431_v20 = vsel %vm429_vm7, %v416_v15, %v430_v9  ;;  %679 = vmatpush.bf16.msra.mxu2 %v1348_v10  ;;  %v1362_v9 = vld [vmem:[#allocation2 + $0xc8] sm:$0xff] }
 0x111   :  { %v435_v23 = vsel %vm428_vm9, %v431_v20, %v434_v21  ;;  %763 = vmatpush.bf16.msra.mxu3 %v1358_v11  ;;  %v1376_v20 = vld [vmem:[#allocation7 + $0x78] sm:$0xff]  ;;  %v1375_v21 = vld [vmem:[#allocation7 + $0x70] sm:$0xff] }
 0x112   :  { %v1803_v26 = vsel %vm425_vm11, nan, %v435_v23  ;;  %847 = vmatpush.bf16.msrb.mxu0 %v1366_v8  ;;  %933 = vmatpush.bf16.msrb.mxu1 %v1376_v20  ;;  %v1374_v23 = vld [vmem:[#allocation7 + $0x68] sm:$0xff] }
 0x113   :  { %v437_v27 = vpack.c.bf16 %v1803_v26, %v1801_v24 }
 0x114   :  { %680 = vmatpush.bf16.msra.mxu2 %v1347_v56 }
 0x115   :  { %512 = vmatmul.bf16.vlgmr.msra.gmra.mxu0 %v437_v27  ;;  %764 = vmatpush.bf16.msra.mxu3 %v1357_v34  ;;  %v1373_v27 = vld [vmem:[#allocation7 + $0x60] sm:$0xff] }
 0x116   :  { %848 = vmatpush.bf16.msrb.mxu0 %v1365_v53  ;;  %934 = vmatpush.bf16.msrb.mxu1 %v1375_v21 }
 0x118   :  { %681 = vmatpush.bf16.msra.mxu2 %v1346_v58 }
 0x119   :  { %765 = vmatpush.bf16.msra.mxu3 %v1356_v2 }
 0x11a   :  { %849 = vmatpush.bf16.msrb.mxu0 %v1364_v48  ;;  %935 = vmatpush.bf16.msrb.mxu1 %v1374_v23 }
 0x11c   :  { %682 = vmatpush.bf16.msra.mxu2 %v1345_v59 }
 0x11d   :  { %766 = vmatpush.bf16.msra.mxu3 %v1355_v3 }
 0x11e   :  { %850 = vmatpush.bf16.msrb.mxu0 %v1363_v19  ;;  %936 = vmatpush.bf16.msrb.mxu1 %v1373_v27 }
 0x120   :  { %952 = vmatpush.bf16.msrb.mxu2 %v1360_v61 }
 0x121   :  { %767 = vmatpush.bf16.msra.mxu3 %v1354_v45 }
 0x122   :  { %851 = vmatpush.bf16.msrb.mxu0 %v1362_v9 }
 0x124   :  { %953 = vmatpush.bf16.msrb.mxu2 %v1359_v14 }
 0x125   :  { %768 = vmatpush.bf16.msra.mxu3 %v1353_v5 }
 0x126   :  { %852 = vmatpush.bf16.msrb.mxu0 %v1361_v18 }
 0x128   :  { %954 = vmatpush.bf16.msrb.mxu2 %v1358_v11 }
 0x129   :  { %969 = vmatpush.bf16.msrb.mxu3 %v1368_v6 }
 0x12c   :  { %955 = vmatpush.bf16.msrb.mxu2 %v1357_v34 }
 0x12d   :  { %970 = vmatpush.bf16.msrb.mxu3 %v1367_v7 }
 0x130   :  { %956 = vmatpush.bf16.msrb.mxu2 %v1356_v2  ;;  %v1384_v2 = vld [vmem:[#allocation7 + $0xb8] sm:$0xff] }
 0x131   :  { %971 = vmatpush.bf16.msrb.mxu3 %v1366_v8  ;;  %1057 = vmatpush.bf16.msra.mxu0 %v1384_v2 }
 0x134   :  { %957 = vmatpush.bf16.msrb.mxu2 %v1355_v3  ;;  %v1383_v3 = vld [vmem:[#allocation7 + $0xb0] sm:$0xff] }
 0x135   :  { %972 = vmatpush.bf16.msrb.mxu3 %v1365_v53  ;;  %1058 = vmatpush.bf16.msra.mxu0 %v1383_v3 }
 0x138   :  { %958 = vmatpush.bf16.msrb.mxu2 %v1354_v45  ;;  %v1382_v45 = vld [vmem:[#allocation7 + $0xa8] sm:$0xff] }
 0x139   :  { %973 = vmatpush.bf16.msrb.mxu3 %v1364_v48  ;;  %1059 = vmatpush.bf16.msra.mxu0 %v1382_v45 }
 0x13c   :  { %959 = vmatpush.bf16.msrb.mxu2 %v1353_v5  ;;  %v1381_v5 = vld [vmem:[#allocation7 + $0xa0] sm:$0xff] }
 0x13d   :  { %974 = vmatpush.bf16.msrb.mxu3 %v1363_v19  ;;  %1060 = vmatpush.bf16.msra.mxu0 %v1381_v5 }
 0x141   :  { %975 = vmatpush.bf16.msrb.mxu3 %v1362_v9 }
 0x145   :  { %976 = vmatpush.bf16.msrb.mxu3 %v1361_v18 }
 0x192   :  { %v513_v54 = vpop.f32.mrf.mxu0 }
 0x193   :  { %v514_v37 = vadd.f32 %v1403_v39, %v513_v54  ;;  %v1372_v54 = vld [vmem:[#allocation7 + $0x58] sm:$0xff] }
 0x194   :  { %937 = vmatpush.bf16.msrb.mxu1 %v1372_v54 }
 0x195   :  { %v518_v43 = vmax.f32 %v514_v37, 0.0  ;;  %v1370_v37 = vld [vmem:[#allocation7 + $0x48] sm:$0xff] }
 0x19a   :  { %v515_v40 = vpop.f32.mrf.mxu0 }
 0x19b   :  { %v516_v0 = vadd.f32 %v1403_v39, %v515_v40  ;;  %v1371_v39 = vld [vmem:[#allocation7 + $0x50] sm:$0xff]  ;;  %v1369_v40 = vld [vmem:[#allocation7 + $0x40] sm:$0xff] }
 0x19c   :  { %938 = vmatpush.bf16.msrb.mxu1 %v1371_v39 }
 0x19d   :  { %v519_v49 = vmax.f32 %v516_v0, 0.0 }
 0x19f   :  { %v520_v55 = vpack.c.bf16 %v519_v49, %v518_v43  ;;  %v1407_v43 = vld [vmem:[#allocation5 + $0x3] ss:$0 sm:$0xff] }
 0x1a0   :  { %939 = vmatpush.bf16.msrb.mxu1 %v1370_v37 }
 0x1a1   :  { %596 = vmatmul.bf16.vlgmr.msra.gmra.mxu1 %v520_v55 }
 0x1a4   :  { %940 = vmatpush.bf16.msrb.mxu1 %v1369_v40 }
 0x21e   :  { %v597_v44 = vpop.f32.mrf.mxu1 }
 0x21f   :  { %v1807_v52 = vadd.f32 %v1404_v50, %v597_v44 }
 0x221   :  { %v604_v25 = vadd.f32 %v602_v36, %v1807_v52 }
 0x223   :  { %v606_v42 = vadd.f32 %v604_v25, %v1801_v24 }
 0x226   :  { %v599_v32 = vpop.f32.mrf.mxu1 }
 0x227   :  { %v1816_v38 = vadd.f32 %v1404_v50, %v599_v32  ;;  %v1408_v50 = vld [vmem:[%s1846_s5 + $0x1] ss:$0 sm:$0xff] }
 0x229   :  { %v605_v31 = vadd.f32 %v603_v62, %v1816_v38 }
 0x22b   :  { %v607_v46 = vadd.f32 %v605_v31, %v1803_v26 }
 0x22d   :  { %v608_v63 = vpack.c.bf16 %v607_v46, %v606_v42 }
 0x22f   :  { %683 = vmatmul.bf16.vlgmr.msra.gmra.mxu2 %v608_v63 }
 0x2b2   :  { %v684_v57 = vpop.f32.mrf.mxu2 }
 0x2b3   :  { %v685_v35 = vadd.f32 %v1405_v60, %v684_v57 }
 0x2b5   :  { %v689_v4 = vmax.f32 %v685_v35, 0.0 }
 0x2b7   :  { %v691_v47 = vadd.f32 %v689_v4, %v602_v36  ;;  %v1379_v4 = vld [vmem:[#allocation7 + $0x90] sm:$0xff] }
 0x2b9   :  { %v861_v58 = vadd.f32 %v691_v47, %v1807_v52 }
 0x2ba   :  { %v686_v13 = vpop.f32.mrf.mxu2 }
 0x2bb   :  { %v687_v15 = vadd.f32 %v1405_v60, %v686_v13  ;;  %v1380_v13 = vld [vmem:[#allocation7 + $0x98] sm:$0xff] }
 0x2bc   :  { %1061 = vmatpush.bf16.msra.mxu0 %v1380_v13 }
 0x2bd   :  { %v690_v16 = vmax.f32 %v687_v15, 0.0  ;;  %v1378_v15 = vld [vmem:[#allocation7 + $0x88] sm:$0xff] }
 0x2bf   :  { %v692_v1 = vadd.f32 %v690_v16, %v603_v62  ;;  %v1377_v16 = vld [vmem:[#allocation7 + $0x80] sm:$0xff] }
 0x2c0   :  { %1062 = vmatpush.bf16.msra.mxu0 %v1379_v4 }
 0x2c1   :  { %v693_v17 = vpack.c.bf16 %v692_v1, %v691_v47  ;;  %v862_v61 = vadd.f32 %v692_v1, %v1816_v38 }
 0x2c3   :  { %769 = vmatmul.bf16.vlgmr.msra.gmra.mxu3 %v693_v17 }
 0x2c4   :  { %1063 = vmatpush.bf16.msra.mxu0 %v1378_v15 }
 0x2c8   :  { %1064 = vmatpush.bf16.msra.mxu0 %v1377_v16 }
 0x346   :  { %v770_v28 = vpop.f32.mrf.mxu3 }
 0x347   :  { %v771_v22 = vadd.f32 %v1406_v12, %v770_v28  ;;  %v1409_v28 = vld [vmem:[%s1846_s5 + $0x2] ss:$0 sm:$0xff]  ;;  %s1534_s5 = smov 8  }
 0x349   :  { %v775_v41 = vmax.f32 %v771_v22, 0.0 }
 0x34e   :  { %v772_v29 = vpop.f32.mrf.mxu3 }
 0x34f   :  { %v773_v33 = vadd.f32 %v1406_v12, %v772_v29 }
 0x351   :  { %v776_v30 = vmax.f32 %v773_v33, 0.0 }
 0x353   :  { %v777_v51 = vpack.c.bf16 %v776_v30, %v775_v41 }
 0x355   :  { %853 = vmatmul.bf16.vlgmr.msrb.gmra.mxu0 %v777_v51 }
 0x3d2   :  { %v854_v0 = vpop.f32.mrf.mxu0 }
 0x3d3   :  { %v855_v49 = vadd.f32 %v1407_v43, %v854_v0 }
 0x3d5   :  { %v859_v10 = vmul.f32 %v855_v49, %v1801_v24 }
 0x3d7   :  { %v863_v14 = vadd.f32 %v861_v58, %v859_v10 }
 0x3da   :  { %v856_v55 = vpop.f32.mrf.mxu0 }
 0x3db   :  { %v857_v56 = vadd.f32 %v1407_v43, %v856_v55 }
 0x3dd   :  { %v860_v59 = vmul.f32 %v857_v56, %v1803_v26 }
 0x3df   :  { %v864_v11 = vadd.f32 %v862_v61, %v860_v59 }
 0x3e1   :  { %v865_v34 = vpack.c.bf16 %v864_v11, %v863_v14 }
 0x3e3   :  { %941 = vmatmul.bf16.vlgmr.msrb.gmra.mxu1 %v865_v34 }
 0x460   :  { %v942_v44 = vpop.f32.mrf.mxu1 }
 0x461   :  { %v943_v36 = vadd.f32 %v1408_v50, %v942_v44 }
 0x463   :  { %v947_v62 = vmax.f32 %v943_v36, 0.0 }
 0x465   :  { %v949_v42 = vadd.f32 %v947_v62, %v691_v47 }
 0x467   :  { %v985_v9 = vadd.f32 %v949_v42, %v1807_v52 }
 0x468   :  { %v944_v32 = vpop.f32.mrf.mxu1 }
 0x469   :  { %v945_v25 = vadd.f32 %v1408_v50, %v944_v32 }
 0x46b   :  { %v948_v31 = vmax.f32 %v945_v25, 0.0 }
 0x46d   :  { %v950_v46 = vadd.f32 %v948_v31, %v692_v1 }
 0x46f   :  { %v951_v63 = vpack.c.bf16 %v950_v46, %v949_v42  ;;  %v986_v20 = vadd.f32 %v950_v46, %v1816_v38 }
 0x471   :  { %960 = vmatmul.bf16.vlgmr.msrb.gmra.mxu2 %v951_v63 }
 0x4f4   :  { %v961_v6 = vpop.f32.mrf.mxu2 }
 0x4f5   :  { %v962_v7 = vadd.f32 %v1406_v12, %v961_v6 }
 0x4f7   :  { %v966_v57 = vmax.f32 %v962_v7, 0.0 }
 0x4fc   :  { %v963_v8 = vpop.f32.mrf.mxu2 }
 0x4fd   :  { %v964_v53 = vadd.f32 %v1406_v12, %v963_v8 }
 0x4ff   :  { %v967_v60 = vmax.f32 %v964_v53, 0.0 }
 0x501   :  { %v968_v35 = vpack.c.bf16 %v967_v60, %v966_v57 }
 0x503   :  { %977 = vmatmul.bf16.vlgmr.msrb.gmra.mxu3 %v968_v35 }
 0x586   :  { %v978_v47 = vpop.f32.mrf.mxu3 }
 0x587   :  { %v979_v1 = vadd.f32 %v1407_v43, %v978_v47 }
 0x589   :  { %v983_v48 = vmul.f32 %v979_v1, %v1801_v24 }
 0x58b   :  { %v987_v21 = vadd.f32 %v985_v9, %v983_v48 }
 0x58e   :  { %v980_v17 = vpop.f32.mrf.mxu3 }
 0x58f   :  { %v981_v19 = vadd.f32 %v1407_v43, %v980_v17 }
 0x591   :  { %v984_v18 = vmul.f32 %v981_v19, %v1803_v26 }
 0x593   :  { %v988_v23 = vadd.f32 %v986_v20, %v984_v18 }
 0x595   :  { %v989_v27 = vpack.c.bf16 %v988_v23, %v987_v21 }
 0x597   :  { %1065 = vmatmul.bf16.vlgmr.msra.gmra.mxu0 %v989_v27 }
 0x614   :  { %v1066_v12 = vpop.f32.mrf.mxu0 }
 0x615   :  { %v1067_v22 = vadd.f32 %v1409_v28, %v1066_v12 }
 0x617   :  { %v1071_v29 = vmax.f32 %v1067_v22, 0.0 }
 0x619   :  { %v1073_v33 = vadd.f32 %v1071_v29, %v949_v42 }
 0x61b   :  { %1075 = vst [vmem:[#allocation8] sm:$0xff] %v1073_v33 }
 0x61c   :  { %v1068_v24 = vpop.f32.mrf.mxu0 }
 0x61d   :  { %v1069_v41 = vadd.f32 %v1409_v28, %v1068_v24 }
 0x61f   :  { %v1072_v26 = vmax.f32 %v1069_v41, 0.0 }
 0x621   :  { %v1074_v52 = vadd.f32 %v1072_v26, %v950_v46 }
 0x623   :  { %1076 = vst [vmem:[#allocation8 + $0x8] sm:$0xff] %v1074_v52 }
 0x624   :  { %1089 = dma.vmem_to_hbm [thread:$0]  %s1082_s24, 256, %s1084_s27, [#allocation4], %s1533_s28, %s1533_s28, %s1534_s5  }
 0x625   :  { %1518 = dma.done.wait [#allocation4], 256  }
 0x626   :  { %1519 = vsyncadd [#allocation4], 4294967040 }
 0x627   :  { %1094 = vsyncpa [#allocation3], 1 }
 0x628   :  { %1095 = vsyncpa [#allocation6], 1 }
 0x629   :  { %1096 = vsyncpa [#allocation4], 1 }

</bundles_post_ra>
